<compile_context>
chip_gen: v7x
topology: tpu7x:2x2x1
jax: 0.10.0
libtpu: 0.0.40
codegen_flags: <defaults>
</compile_context>

<pallas_src>
import jax
import jax.numpy as jnp
from jax.experimental import pallas as pl
from jax.experimental.pallas import tpu as pltpu


def _round_up(x, m):
    return ((x + m - 1) // m) * m


def _plan_spatial_tile(P, n_feat, n_prob,
                       data_budget_bytes=12 << 20, max_lanes=131072):
    """Lane-dense spatial tile TP (multiple of 128) sized from a VMEM budget
    for the double-buffered per-step working set, plus padded spatial extent."""
    bytes_per_lane = (n_feat + 2 * n_prob) * 4 * 2   # lo + gp + out, x2 buffers
    lanes = data_budget_bytes // bytes_per_lane
    lanes = max(128, (lanes // 128) * 128)
    lanes = min(lanes, max_lanes)
    TP = min(lanes, _round_up(P, 128))
    P_pad = _round_up(P, TP)
    return TP, P_pad


def _prob_graph_kernel(wl_ref, sc_ref, lo_ref, gp_ref, o_ref):
    """One (spatial-tile, batch) block.

    wl_ref : VMEM (n_prob, n_feat)  local half of the 1x1-conv weight (resident)
    sc_ref : SMEM (2,) f32          [scale, offset] for the gamma affine
    lo_ref : VMEM (n_feat, TP)      local_view slab (channel-major, lane-dense)
    gp_ref : VMEM (n_prob, TP)      batch-invariant Wg @ learnable + bias
    o_ref  : VMEM (n_prob, TP)      output slab
    """
    acc = jnp.dot(wl_ref[...], lo_ref[...],
                  preferred_element_type=jnp.float32) + gp_ref[...]
    # TODO(synk): exact scale_hard_tanh source not provided; canonical form
    # used: hardtanh to [-1, 1] then affine rescale to [gamma_lower, gamma_upper].
    y = sc_ref[1] + sc_ref[0] * jnp.clip(acc, -1.0, 1.0)
    o_ref[...] = y.astype(o_ref.dtype)


def probability_model_forward(local_view, learnable_matrix, conv_w, conv_b,
                              gamma_lower, gamma_upper):
    """local_view: (B, n_feat, N, N) NCHW float32
       learnable_matrix: (n_GMB, N, N)
       conv_w: (n_prob, n_GMB + n_feat, 1, 1), conv_b: (n_prob,)
       returns prob_graph: (B, n_prob, N, N) NCHW float32 (eval mode, no noise)
    """
    B, n_feat, N, _ = local_view.shape
    n_GMB = learnable_matrix.shape[0]
    n_prob = conv_w.shape[0]
    P = N * N

    # 1x1 conv weight split must match torch.cat((global_view, local_view), dim=1)
    w2 = conv_w[..., 0, 0].astype(jnp.float32)          # (n_prob, n_GMB + n_feat)
    assert w2.shape[1] == n_GMB + n_feat
    wg = w2[:, :n_GMB]                                   # global half
    wl = w2[:, n_GMB:]                                   # local half (n_prob, n_feat)

    # Batch-invariant global contribution (+ bias), computed once (tiny).
    lm_flat = learnable_matrix.reshape(n_GMB, P).astype(jnp.float32)
    gp = (jnp.dot(wg, lm_flat, preferred_element_type=jnp.float32)
          + conv_b.astype(jnp.float32)[:, None])         # (n_prob, P)

    # NCHW -> (B, n_feat, P): free contiguous reshape, spatial on the lane axis.
    lo = local_view.reshape(B, n_feat, P).astype(jnp.float32)

    # Spatial tiling: large lane-dense tiles from a VMEM budget; pad P if needed.
    TP, P_pad = _plan_spatial_tile(P, n_feat, n_prob)
    if P_pad != P:
        lo = jnp.pad(lo, ((0, 0), (0, 0), (0, P_pad - P)))
        gp = jnp.pad(gp, ((0, 0), (0, P_pad - P)))

    # Fold gamma rescale into one FMA: y = offset + scale * clip(x, -1, 1).
    scale = 0.5 * (gamma_upper - gamma_lower)
    offset = gamma_lower + scale
    sc = jnp.asarray([scale, offset], jnp.float32)       # SMEM, no recompile per gamma

    num_tiles = P_pad // TP
    grid = (num_tiles, B)    # spatial outer, batch inner -> gp tile stays resident

    # Explicit VMEM limit: covers the double-buffered tiles + compiler scratch,
    # raises v5e's 16 MiB default, stays well under v7x's 64 MiB physical VMEM.
    data_bytes = 2 * (n_feat + 2 * n_prob) * TP * 4
    vmem_limit = int(min(48 << 20, max(32 << 20, data_bytes + (4 << 20))))

    out = pl.pallas_call(
        _prob_graph_kernel,
        grid=grid,
        out_shape=jax.ShapeDtypeStruct((B, n_prob, P_pad), local_view.dtype),
        in_specs=[
            pl.BlockSpec((n_prob, n_feat), lambda p, b: (0, 0)),        # wl, resident
            pl.BlockSpec(memory_space=pltpu.MemorySpace.SMEM),          # [scale, offset]
            pl.BlockSpec((None, n_feat, TP), lambda p, b: (b, 0, p)),   # local slab
            pl.BlockSpec((n_prob, TP), lambda p, b: (0, p)),            # global partial
        ],
        out_specs=pl.BlockSpec((None, n_prob, TP), lambda p, b: (b, 0, p)),
        compiler_params=pltpu.CompilerParams(
            dimension_semantics=("parallel", "parallel"),
            vmem_limit_bytes=vmem_limit),
    )(wl, sc, lo, gp)

    if P_pad != P:
        out = out[:, :, :P]
    # (B, n_prob, P) -> (B, n_prob, N, N): free reshape, already NCHW.
    return out.reshape(B, n_prob, N, N)


def _reference_forward(local_view, learnable_matrix, conv_w, conv_b, lo_g, up_g):
    B = local_view.shape[0]
    n_GMB, N, _ = learnable_matrix.shape
    global_view = jnp.broadcast_to(learnable_matrix[None], (B, n_GMB, N, N))
    x = jnp.concatenate([global_view, local_view], axis=1)          # (B, Cin, N, N)
    w2 = conv_w[..., 0, 0]                                           # (Cout, Cin)
    y = jnp.einsum('bchw,oc->bohw', x, w2) + conv_b[None, :, None, None]
    y = jnp.clip(y, -1.0, 1.0)
    return lo_g + (y + 1.0) * 0.5 * (up_g - lo_g)


if __name__ == "__main__":
    # Small shapes consistent with the module.
    batch_size, n_nodes = 2, 16
    n_feat, n_GMB, n_prob = 4, 4, 4
    gamma_lower, gamma_upper = 0.0, 1.0

    key = jax.random.PRNGKey(0)
    k1, k2, k3, k4 = jax.random.split(key, 4)

    # Deterministic synthetic parameters (no checkpoint load).
    topo_graph = jax.random.uniform(k1, (n_GMB, n_nodes, n_nodes), jnp.float32)
    local_view = jax.random.normal(k2, (batch_size, n_feat, n_nodes, n_nodes),
                                   jnp.float32)
    conv_w = 0.1 * jax.random.normal(k3, (n_prob, n_GMB + n_feat, 1, 1),
                                     jnp.float32)
    conv_b = 0.1 * jax.random.normal(k4, (n_prob,), jnp.float32)

    out = probability_model_forward(local_view, topo_graph, conv_w, conv_b,
                                    gamma_lower, gamma_upper)
    out = jax.block_until_ready(out)

    ref = _reference_forward(local_view, topo_graph, conv_w, conv_b,
                             gamma_lower, gamma_upper)
    assert out.shape == (batch_size, n_prob, n_nodes, n_nodes)
    assert jnp.allclose(out, ref, atol=1e-5, rtol=1e-5)

    print("KERNEL_OK")
</pallas_src>

<mosaic_0001>
module attributes {stable_mosaic.version = 11 : i64} {
  func.func @_prob_graph_kernel(%arg0: i32, %arg1: i32, %arg2: memref<4x4xf32, #tpu.memory_space<vmem>>, %arg3: memref<2xf32, #tpu.memory_space<smem>>, %arg4: memref<1x4x256xf32, #tpu.memory_space<vmem>>, %arg5: memref<4x256xf32, #tpu.memory_space<vmem>>, %arg6: memref<1x4x256xf32, #tpu.memory_space<vmem>>) attributes {dimension_semantics = [#tpu.dimension_semantics<parallel>, #tpu.dimension_semantics<parallel>], iteration_bounds = array<i64: 1, 2>, scalar_prefetch = 0 : i64, scratch_operands = 0 : i64, tpu.core_type = #tpu.core_type<tc>, window_params = [{pipeline_mode = #tpu.pipeline_mode<synchronous>, transform_indices = @transform_0, window_bounds = array<i64: 4, 4>}, {transform_indices = @transform_1, window_bounds = array<i64: 2>}, {transform_indices = @transform_2, window_bounds = array<i64: 1, 4, 256>}, {transform_indices = @transform_3, window_bounds = array<i64: 4, 256>}, {transform_indices = @transform_4, window_bounds = array<i64: 1, 4, 256>}]} {
    %c0 = arith.constant 0 : index
    %c0_0 = arith.constant 0 : index
    %0 = vector.load %arg2[%c0, %c0_0] : memref<4x4xf32, #tpu.memory_space<vmem>>, vector<4x4xf32>
    %c0_1 = arith.constant 0 : index
    %c0_2 = arith.constant 0 : index
    %c0_3 = arith.constant 0 : index
    %1 = vector.load %arg4[%c0_1, %c0_2, %c0_3] : memref<1x4x256xf32, #tpu.memory_space<vmem>>, vector<1x4x256xf32>
    %2 = vector.shape_cast %1 : vector<1x4x256xf32> to vector<4x256xf32>
    %cst = arith.constant dense<0.000000e+00> : vector<4x256xf32>
    %3 = tpu.matmul %0, %2, %cst {dimension_numbers = #tpu.dot_dimension_numbers<[1], [0], [0], [1], [0, 0, 1, 1], [], []>} : vector<4x4xf32>, vector<4x256xf32>, vector<4x256xf32> -> vector<4x256xf32>
    %c0_4 = arith.constant 0 : index
    %c0_5 = arith.constant 0 : index
    %4 = vector.load %arg5[%c0_4, %c0_5] : memref<4x256xf32, #tpu.memory_space<vmem>>, vector<4x256xf32>
    %5 = arith.addf %3, %4 : vector<4x256xf32>
    %c1 = arith.constant 1 : index
    %6 = memref.load %arg3[%c1] : memref<2xf32, #tpu.memory_space<smem>>
    %c0_6 = arith.constant 0 : index
    %7 = memref.load %arg3[%c0_6] : memref<2xf32, #tpu.memory_space<smem>>
    %cst_7 = arith.constant -1.000000e+00 : f32
    %cst_8 = arith.constant 1.000000e+00 : f32
    %8 = vector.broadcast %cst_7 : f32 to vector<4x256xf32>
    %9 = arith.maximumf %8, %5 : vector<4x256xf32>
    %10 = vector.broadcast %cst_8 : f32 to vector<4x256xf32>
    %11 = arith.minimumf %10, %9 : vector<4x256xf32>
    %12 = vector.broadcast %7 : f32 to vector<4x256xf32>
    %13 = arith.mulf %12, %11 : vector<4x256xf32>
    %14 = vector.broadcast %6 : f32 to vector<4x256xf32>
    %15 = arith.addf %14, %13 : vector<4x256xf32>
    %c0_9 = arith.constant 0 : index
    %c0_10 = arith.constant 0 : index
    %c0_11 = arith.constant 0 : index
    %16 = vector.load %arg6[%c0_9, %c0_10, %c0_11] : memref<1x4x256xf32, #tpu.memory_space<vmem>>, vector<1x4x256xf32>
    %17 = vector.shape_cast %16 : vector<1x4x256xf32> to vector<4x256xf32>
    %18 = vector.shape_cast %15 : vector<4x256xf32> to vector<1x4x256xf32>
    tpu.vector_store %arg6[%c0_9, %c0_10, %c0_11], %18 {strides = array<i32>} : memref<1x4x256xf32, #tpu.memory_space<vmem>>, vector<1x4x256xf32>,
    return
  }
  func.func @transform_0(%arg0: i32, %arg1: i32) -> (i32, i32) {
    %c0_i32 = arith.constant 0 : i32
    %c0_i32_0 = arith.constant 0 : i32
    %c0_i32_1 = arith.constant 0 : i32
    return %c0_i32, %c0_i32_0 : i32, i32
  }
  func.func @transform_1(%arg0: i32, %arg1: i32) -> i32 {
    %c0_i32 = arith.constant 0 : i32
    %c0_i32_0 = arith.constant 0 : i32
    return %c0_i32 : i32
  }
  func.func @transform_2(%arg0: i32, %arg1: i32) -> (i32, i32, i32) {
    %c0_i32 = arith.constant 0 : i32
    %c0_i32_0 = arith.constant 0 : i32
    return %arg1, %c0_i32, %arg0 : i32, i32, i32
  }
  func.func @transform_3(%arg0: i32, %arg1: i32) -> (i32, i32) {
    %c0_i32 = arith.constant 0 : i32
    %c0_i32_0 = arith.constant 0 : i32
    return %c0_i32, %arg0 : i32, i32
  }
  func.func @transform_4(%arg0: i32, %arg1: i32) -> (i32, i32, i32) {
    %c0_i32 = arith.constant 0 : i32
    %c0_i32_0 = arith.constant 0 : i32
    return %arg1, %c0_i32, %arg0 : i32, i32, i32
  }
}

</mosaic_0001>

<bundles_post_ra>
// kernel: tpu_custom_call.1
= control target key start
LH: loop header
LB: loop body
LE: loop exit
PB: predicated region body
PF: predicated region fallthrough
CT: control target
= control target key end

     0   :  { %9 = vsyncpa [#allocation3], 0  ;;  %s1079_s0 = inlined_call_operand.hbm [shape: f32[4,4], index: 0, kind: input, shape index: {}]   ;;  %s1080_s1 = inlined_call_operand.vmem [shape: f32[2], index: 1, kind: input, shape index: {}]   ;;  %s1081_s2 = inlined_call_operand.hbm [shape: f32[2,4,256], index: 2, kind: input, shape index: {}]   ;;  %s1082_s3 = inlined_call_operand.vmem [shape: f32[4,256], index: 3, kind: input, shape index: {}]   ;;  %s1083_s4 = inlined_call_operand.hbm [shape: f32[2,4,256], index: 4, kind: output, shape index: {}]  }
   0x1   :  { %10 = vsyncpa [#allocation5], 0 }
   0x2   :  { %11 = vsyncpa [#allocation8], 0 }
   0x3   :  { %13 = vsyncpa [#allocation8 + $0x1], 0 }
   0x4   :  { %14 = vsyncpa [#allocation4], 0 }
   0x5   :  { %16 = vsyncpa [#allocation4 + $0x1], 0  ;;  %s837_s15 = smov 0   ;;  %s839_s16 = smov 0  }
   0x6   :  { %s841_s17 = smov 0   ;;  %s843_s18 = smov 0  }
   0x7   :  { %s845_s19 = smov 0   ;;  %s847_s20 = smov 0  }
   0x8 LB: > { %s528_s21 = sadd.s32 4294967295, %s805_s20   ;;  %s529_s22 = sadd.s32 4294967294, %s805_s20   ;;  %s805_s20 = sphi %s847_s20, %s22_s20   ;;  %s801_s19 = sphi %s845_s19, %s1106_s19   ;;  %s797_s18 = sphi %s843_s18, %s1105_s18   ;;  %s793_s17 = sphi %s841_s17, %s1104_s17   ;;  %s789_s16 = sphi %s839_s16, %s1103_s16   ;;  %s785_s15 = sphi %s837_s15, %s1102_s15  }
   0x9   : > { %p98_p0 = scmp.ne.s32.totalorder %s789_s16, %s785_s15  ;;  %p871_p1 = scmp.eq.s32.totalorder %s528_s21, 0 }
   0xa   : > { %p875_p2 = scmp.eq.s32.totalorder %s528_s21, 1  ;;  %p156_p3 = scmp.eq.s32.totalorder %s529_s22, 1 }
   0xb   : > { %s1088_s23 = scalar_select %p871_p1, 1, 0 }
   0xc   : > { %s1089_s24 = scalar_select %p875_p2, 1, 0 }
   0xd   : > { %p881_p4 = por %p871_p1, %p98_p0  ;;  %p530_p5 = scmp.ge.s32.totalorder %s805_s20, 1 }
   0xe   : > { %p886_p6 = por %p156_p3, %p98_p0  ;;  %p163_p7 = scmp.lt.s32.totalorder %s805_s20, 3 }
   0xf   : > { %s1090_s25 = scalar_select %p881_p4, 1, 0 }
  0x10   : > { %s1091_s26 = scalar_select %p886_p6, 1, 0 }
  0x11   : > { %p891_p8 = pnand %p530_p5, %p163_p7  ;;  %s807_s28 = smov [#allocation2]  }
  0x12   : > { %s176_s29 = sshll.u32 %s807_s28, 4  ;;  %s187_s6 = sshll.u32 %s1080_s1, 4  ;;  %s177_s29 = int_to_ptr.vmem [resolvable:$true] %s176_s29  ;;  %s901_s6 = int_to_ptr.vmem [resolvable:$true] %s187_s6 }
  0x13   : > { %s1092_s27 = scalar_select %p891_p8, 1, 0 }
  0x14   : > { %p568_p10 = pneg %p891_p8  ;;  %s642_s10 = scalar_lea.hbm %s1079_s0, 64 }
  0x15   : > { %p643_p12 = scmp.ne.s32.totalorder %s1079_s0, %s642_s10  ;;  %p649_p5 = scmp.lt.u32.totalorder %s642_s10, %s1079_s0 }
  0x16   : > { %p905_p11 = pnand %p568_p10, %p871_p1 }
  0x18   : > { %p644_p13 = pneg %p905_p11 }
  0x1a   : > { %p645_p0 = pnand %p644_p13, %p643_p12 }
  0x1c   : > { %p646_p3 = pneg %p645_p0 }
  0x1e   : > { %p651_p7 = pnand %p649_p5, %p646_p3 }
  0x20   : > { %654 = shalt.err (!%p651_p7)
}
  0x21   : > { %s655_s21 = scalar_lea.vmem %s177_s29, 64  ;;  %p663_p4 = scmp.lt.s32.totalorder %s177_s29, %s177_s29 }
  0x22   : > { %p656_p10 = scmp.ne.s32.totalorder %s177_s29, %s655_s21  ;;  %p664_p1 = scmp.lt.s32.totalorder %s655_s21, %s655_s21 }
  0x24   : > { %p658_p9 = pnand %p656_p10, %p644_p13  ;;  %p665_p8 = por %p664_p1, %p663_p4 }
  0x26   : > { %p659_p6 = pneg %p658_p9 }
  0x28   : > { %p666_p2 = pnand %p665_p8, %p659_p6 }
  0x2a   : > { %669 = shalt.err (!%p666_p2)
}
  0x2b   : > { %571 = dma.hbm_to_vmem [thread:$0]  (!%p905_p11), %s1079_s0, 64, %s177_s29, [#allocation3]  }
  0x2c   : > { %s670_s30 = scalar_lea.vmem %s901_s6, 16  ;;  %p678_p1 = scmp.lt.s32.totalorder %s901_s6, %s901_s6 }
  0x2d   : > { %p671_p12 = scmp.ne.s32.totalorder %s901_s6, %s670_s30  ;;  %p679_p4 = scmp.lt.s32.totalorder %s670_s30, %s670_s30 }
  0x2f   : > { %p673_p9 = pnand %p671_p12, %p644_p13  ;;  %p680_p2 = por %p679_p4, %p678_p1 }
  0x31   : > { %p674_p0 = pneg %p673_p9 }
  0x33   : > { %p681_p6 = pnand %p680_p2, %p674_p0 }
  0x35   : > { %684 = shalt.err (!%p681_p6)
}
  0x36   : > { %s808_s5 = smov [#allocation6]   ;;  %s31_s29 = sadd.s32 1, %s801_s19 }
  0x37   : > { %574 = dma.vmem_to_smem (!%p905_p11), %s901_s6, 16, %s808_s5, [#allocation5]  }
  0x38   : > { %s85_s8 = sadd.s32 1, %s793_s17  ;;  %p32_p8 = scmp.ge.s32.totalorder %s31_s29, 2 }
  0x39   : > { %p92_p13 = scmp.ne.s32.totalorder %s793_s17, %s789_s16  ;;  %p93_p3 = scmp.eq.s32.totalorder %s805_s20, 0 }
  0x3a   : > { %p585_p5 = scmp.lt.s32.totalorder %s805_s20, 2  ;;  %s1108_s29 = smov (%p32_p8, %s31_s29), 0 }
  0x3b   : > { %p94_p7 = por %p93_p3, %p92_p13  ;;  %p1094_p10 = scmp.ne.s32.totalorder %s1089_s24, 0 }
  0x3c   : > { %s80_s9 = ssub.s32 %s801_s19, %s1108_s29  ;;  %s207_s10 = sand.u32 1, %s793_s17  }
  0x3d   : > { %p951_p12 = por %p1094_p10, %p92_p13  ;;  %p83_p9 = scmp.eq.s32.totalorder %s80_s9, 0 }
  0x3e   : > { %s535_s6 = sshll.u32 %s207_s10, 3  ;;  %s554_s11 = sshll.u32 %s801_s19, 7 }
  0x3f   : > { %s960_s12 = scalar_select %p83_p9, %s793_s17, %s85_s8  }
  0x40   : > { %s965_s21 = scalar_lea.hbm %s1081_s2, %s554_s11  ;;  %s211_s24 = scalar_lea.vmem [#allocation7], %s535_s6 }
  0x41   : > { %s221_s22 = sshll.u32 %s211_s24, 4  ;;  %p969_p11 = pnand %p585_p5, %p94_p7  ;;  %s973_s22 = int_to_ptr.vmem [resolvable:$true] %s221_s22 }
  0x42   : > { %s208_s30 = scalar_lea.sflag [#allocation8], %s207_s10  ;;  %s685_s5 = scalar_lea.hbm %s965_s21, 128 }
  0x43   : > { %p686_p0 = scmp.ne.s32.totalorder %s965_s21, %s685_s5  ;;  %p687_p1 = pneg %p969_p11 }
  0x44   : > { %s690_s6 = scalar_lea.hbm %s1081_s2, 256  ;;  %p691_p6 = scmp.lt.u32.totalorder %s965_s21, %s1081_s2 }
  0x45   : > { %p688_p4 = pnand %p687_p1, %p686_p0  ;;  %p692_p8 = scmp.lt.u32.totalorder %s690_s6, %s685_s5 }
  0x46   : > { %p694_p3 = scmp.lt.u32.totalorder %s685_s5, %s965_s21 }
  0x47   : > { %p689_p2 = pneg %p688_p4  ;;  %p693_p13 = por %p692_p8, %p691_p6 }
  0x49   : > { %p695_p5 = por %p694_p3, %p693_p13 }
  0x4b   : > { %p696_p7 = pnand %p695_p5, %p689_p2 }
  0x4d   : > { %699 = shalt.err (!%p696_p7)
}
  0x4e   : > { %s700_s10 = scalar_lea.vmem %s973_s22, 128  ;;  %s809_s14 = smov [#allocation7]  }
  0x4f   : > { %p701_p10 = scmp.ne.s32.totalorder %s973_s22, %s700_s10  ;;  %s705_s24 = sshll.u32 %s809_s14, 4  ;;  %s706_s24 = int_to_ptr.vmem [resolvable:$false] %s705_s24 }
  0x50   : > { %s707_s8 = scalar_lea.vmem %s706_s24, 256  ;;  %p708_p4 = scmp.lt.s32.totalorder %s973_s22, %s706_s24 }
  0x51   : > { %p703_p9 = pnand %p701_p10, %p687_p1  ;;  %p709_p6 = scmp.lt.s32.totalorder %s707_s8, %s700_s10 }
  0x53   : > { %p704_p0 = pneg %p703_p9  ;;  %p710_p8 = por %p709_p6, %p708_p4 }
  0x55   : > { %p711_p13 = pnand %p710_p8, %p704_p0 }
  0x57   : > { %714 = shalt.err (!%p711_p13)
}
  0x58   : > { %578 = dma.hbm_to_vmem [thread:$0]  (!%p969_p11), %s965_s21, 128, %s973_s22, %s208_s30  }
  0x59   : > { %p1097_p2 = scmp.ne.s32.totalorder %s1092_s27, 0 }
  0x5a   : > { %p1098_p1 = scmp.ne.s32.totalorder (!%p1097_p2), %s1088_s23, 0 }
  0x5b   : > { %230 = sbr.rel (%p1097_p2) target bundleno = 349 (0x15d), region = 36 }
  0x62   : > { %768 = dma.done.wait (%p1098_p1), [#allocation3], 64  }
  0x63   : > { %770 = vsyncadd (%p1098_p1), [#allocation3], 4294967232 }
  0x64   : > { %772 = dma.done.wait (%p1098_p1), [#allocation5], 16  }
  0x65   : > { %774 = vsyncadd (%p1098_p1), [#allocation5], 4294967280  ;;  %s1011_s28 = sand.u32 1, %s789_s16   ;;  %p1099_p11 = scmp.ne.s32.totalorder %s1090_s25, 0 }
  0x66   : > { %s541_s27 = sshll.u32 %s1011_s28, 3  ;;  %s241_s21 = scalar_lea.sflag [#allocation8], %s1011_s28 }
  0x67   : > { %s244_s22 = scalar_lea.vmem [#allocation7], %s541_s27 }
  0x68   : > { %776 = dma.done.wait (%p1099_p11), %s241_s21, 128  }
  0x69   : > { %778 = vsyncadd (%p1099_p11), %s241_s21, 4294967168 }
  0x6a   : > { %249 = sfence }
  0x6b   : > { %v284_v0 = vld [vmem:[%s244_s22] sm:$0xff]  ;;  %vm295_vm0 = vcmask 1043456   ;;  %v810_v2 = vmov 0.0   ;;  %v283_v3 = vld [vmem:[#allocation2] sm:$0xf]  ;;  %vm291_vm1 = vcmask 31744  }
  0x6c   : > { %v287_v1 = vcombine.high %v284_v0, %v284_v0  ;;  %364 = vmatprep.mubr.f32.mxu0 %v810_v2  ;;  %s372_s23 = sld [smem:[#allocation6]]  ;;  %v285_v4 = vld [vmem:[%s1082_s3] sm:$0xff]  ;;  %s546_s25 = sld [smem:[#allocation6 + $0x1]] }
  0x6d   : > { %v289_v5 = vcombine.high %v285_v4, %v285_v4  ;;  %s555_s9 = sshll.u32 %s797_s18, 7  ;;  %s274_s6 = scalar_lea.vmem [#allocation9], %s541_s27 }
  0x6e   : > { %543 = vmatprep.subr.msk.mxu0 %vm295_vm0, %v287_v1  ;;  %s405_s11 = sshll.u32 %s274_s6, 4  ;;  %s1030_s14 = scalar_lea.hbm %s1083_s4, %s555_s9  ;;  %s1032_s11 = int_to_ptr.vmem [resolvable:$true] %s405_s11 }
  0x6f   : > { %544 = vmatpush1.msk.msra.mxu0 %vm295_vm0, %v284_v0  ;;  %s389_s24 = scalar_lea.sflag [#allocation4], %s1011_s28  ;;  %s715_s8 = scalar_lea.vmem %s1032_s11, 128 }
  0x70   : > { %545 = vmatmul.mubr.msk.f32.vlgmr.msra.gmra.mrb[0].mxu0 %vm291_vm1, %v283_v3  ;;  %p716_p3 = scmp.ne.s32.totalorder %s1032_s11, %s715_s8  ;;  %s811_s18 = smov [#allocation9]  }
  0x71   : > { %s719_s27 = sshll.u32 %s811_s18, 4  ;;  %s720_s27 = int_to_ptr.vmem [resolvable:$false] %s719_s27 }
  0x72   : > { %v377_v9 = vstv %s372_s23  ;;  %v380_v12 = vstv %s546_s25  ;;  %p717_p5 = pnand %p716_p3, %p951_p12  ;;  %s721_s21 = scalar_lea.vmem %s720_s27, 256 }
  0x73   : > { %p722_p10 = scmp.lt.s32.totalorder %s1032_s11, %s720_s27  ;;  %p723_p9 = scmp.lt.s32.totalorder %s721_s21, %s715_s8 }
  0x74   : > { %p718_p7 = pneg %p717_p5 }
  0x75   : > { %p724_p0 = por %p723_p9, %p722_p10 }
  0x77   : > { %p725_p4 = pnand %p724_p0, %p718_p7 }
 0x143   : > { %v366_v6 = vpop.f32.mrb[0].mxu0 }
 0x144   : > { %v367_v7 = vadd.f32 %v366_v6, %v285_v4  ;;  %v368_v8 = vpop.f32.mrb[1].mxu0 }
 0x145   : > { %v369_v10 = vadd.f32 %v368_v8, %v289_v5 }
 0x146   : > { %v547_v11 = vclamps-f32 %v367_v7, 1.0 }
 0x147   : > { %v548_v13 = vclamps-f32 %v369_v10, 1.0 }
 0x148   : > { %v378_v14 = vmul.f32 %v547_v11, %v377_v9 }
 0x149   : > { %v379_v15 = vmul.f32 %v548_v13, %v377_v9 }
 0x14a   : > { %v381_v16 = vadd.f32 %v380_v12, %v378_v14 }
 0x14b   : > { %v382_v17 = vadd.f32 %v380_v12, %v379_v15 }
 0x14d   : > { %v385_v18 = vcombine.low %v381_v16, %v382_v17 }
 0x14f   : > { %387 = vst [vmem:[%s274_s6] sm:$0xff] %v385_v18 }
 0x150   : > { %728 = shalt.err (!%p725_p4)
}
 0x151   : > { %s729_s28 = scalar_lea.hbm %s1030_s14, 128  ;;  %s733_s30 = scalar_lea.hbm %s1083_s4, 256 }
 0x152   : > { %p730_p6 = scmp.ne.s32.totalorder %s1030_s14, %s729_s28  ;;  %p734_p2 = scmp.lt.u32.totalorder %s1030_s14, %s1083_s4 }
 0x153   : > { %p735_p1 = scmp.lt.u32.totalorder %s733_s30, %s729_s28  ;;  %p737_p3 = scmp.lt.u32.totalorder %s729_s28, %s1030_s14 }
 0x154   : > { %p731_p8 = pnand %p730_p6, %p951_p12 }
 0x155   : > { %p736_p11 = por %p735_p1, %p734_p2 }
 0x156   : > { %p732_p13 = pneg %p731_p8 }
 0x157   : > { %p738_p5 = por %p737_p3, %p736_p11 }
 0x159   : > { %p739_p7 = pnand %p738_p5, %p732_p13 }
 0x15b   : > { %742 = shalt.err (!%p739_p7)
}
 0x15c   : > { %566 = dma.vmem_to_hbm [thread:$0]  (%p951_p12), %s1032_s11, 128, %s1030_s14, %s389_s24  }
 0x15d PF: > { %s417_s9 = sand.u32 1, %s785_s15   ;;  %p1100_p10 = scmp.ne.s32.totalorder %s1091_s26, 0 }
 0x15e   : > { %p1101_p9 = scmp.ge.s32.totalorder %s805_s20, 2  ;;  %s418_s6 = scalar_lea.sflag [#allocation4], %s417_s9 }
 0x160   : > { %p580_p0 = pnand %p1101_p9, %p1100_p10 }
 0x162   : > { %780 = dma.done.wait (!%p580_p0), %s418_s6, 128  }
 0x163   : > { %782 = vsyncadd (!%p580_p0), %s418_s6, 4294967168  ;;  %s22_s20 = sadd.s32 1, %s805_s20   ;;  %s1102_s15 = smov %s789_s16 }
 0x164   : > { %p19_p4 = scmp.ge.s32.totalorder %s22_s20, 4   ;;  %s1103_s16 = smov %s793_s17 }
 0x165   : > { %s1104_s17 = smov %s960_s12  ;;  %s1105_s18 = smov %s801_s19 }
 0x166   : > { %s1106_s19 = smov %s1108_s29  ;;  %21 = sbr.rel (!%p19_p4) target bundleno = 8 (0x8), region = 94 }
 0x16d   :  { %423 = vsyncpa [#allocation3], 1 }
 0x16e   :  { %425 = vsyncpa [#allocation3 + $0x1], 1 }
 0x16f   :  { %426 = vsyncpa [#allocation8], 1 }
 0x170   :  { %428 = vsyncpa [#allocation8 + $0x1], 1 }
 0x171   :  { %429 = vsyncpa [#allocation4], 1 }
 0x172   :  { %431 = vsyncpa [#allocation4 + $0x1], 1 }
 0x173   :  { %432 = vsyncpa [#allocation5], 1 }
 0x174   :  { %434 = vsyncpa [#allocation5 + $0x1], 1 }

</bundles_post_ra>
